<compile_context>
chip_gen: v7x
topology: tpu7x:2x2x1
jax: 0.10.0
libtpu: 0.0.40
codegen_flags: <defaults>
</compile_context>

<pallas_src>
import jax
import jax.numpy as jnp
from jax import lax
from jax.experimental import pallas as pl
from jax.experimental.pallas import tpu as pltpu


def _round_up(n, m):
    return ((n + m - 1) // m) * m


def dqn_kernel(x_ref, w1_ref, b1_ref, w2_ref, b2_ref, w3t_ref, b3t_ref, ot_ref):
    x = x_ref[...]
    if x.dtype != jnp.bfloat16:          # free VPU cast; pass bf16 x to skip it
        x = x.astype(jnp.bfloat16)

    # fc1 (+ folded BN1) + ReLU        [dropout1: identity in eval mode]
    h1 = jnp.dot(x, w1_ref[...], preferred_element_type=jnp.float32)
    h1 = jnp.maximum(h1 + b1_ref[...], 0.0)

    # fc2 (+ folded BN2) + ReLU        [dropout2: identity in eval mode]
    h2 = jnp.dot(h1.astype(jnp.bfloat16), w2_ref[...],
                 preferred_element_type=jnp.float32)
    h2 = jnp.maximum(h2 + b2_ref[...], 0.0)

    # fc3, computed directly in transposed orientation:
    #   out^T (o_pad, TB) = W3^T (o_pad, h2_p) @ h2^T   (contract last dims)
    # -> narrow, lane-dense f32 store; only o_pad rows of output hit HBM.
    h3t = lax.dot_general(w3t_ref[...], h2.astype(jnp.bfloat16),
                          dimension_numbers=(((1,), (1,)), ((), ())),
                          preferred_element_type=jnp.float32)
    ot_ref[...] = h3t + b3t_ref[...]


def dqn_forward(x, params, *, o_dim, tb=2048):
    """x: (B, i_dim) float32 or bfloat16. params: folded/padded (see init_params)."""
    B, i_dim = x.shape
    h_dim_p = params["w1"].shape[1]
    h2_p = params["w2"].shape[1]
    o_pad = params["w3t"].shape[0]

    # ---- batch tile ---------------------------------------------------------
    B8 = _round_up(B, 8)
    if B8 >= 512:
        # Large tiles amortize per-step pipeline overhead; cap at half the
        # (128-aligned) batch so there are >=2 grid steps and the "parallel"
        # batch axis shards across v7x's two TensorCores.  128-aligned TB keeps
        # the transposed (o_pad, TB) output block lane-dense.
        TB = max(128, min(tb, _round_up((B8 + 1) // 2, 128)))
    else:
        TB = B8                          # single grid step; block = whole batch
    B_p = _round_up(B8, TB)
    if B_p != B:
        x = jnp.pad(x, ((0, B_p - B), (0, 0)))
    grid = (B_p // TB,)

    const = lambda i: (0, 0)             # weights/biases: same block every step

    bytes_accessed = (x.size * x.dtype.itemsize
                      + params["w1"].size * params["w1"].dtype.itemsize
                      + params["w2"].size * params["w2"].dtype.itemsize
                      + params["w3t"].size * params["w3t"].dtype.itemsize
                      + (params["b1"].size + params["b2"].size
                         + params["b3t"].size) * 4
                      + o_pad * B_p * 4)
    cost = pl.CostEstimate(
        flops=2 * B_p * (i_dim * h_dim_p + h_dim_p * h2_p + h2_p * o_pad),
        transcendentals=0,
        bytes_accessed=bytes_accessed,
    )

    out_t = pl.pallas_call(
        dqn_kernel,
        out_shape=jax.ShapeDtypeStruct((o_pad, B_p), jnp.float32),
        grid=grid,
        in_specs=[
            pl.BlockSpec((TB, i_dim), lambda i: (i, 0)),   # streamed batch tile
            pl.BlockSpec(params["w1"].shape, const),
            pl.BlockSpec(params["b1"].shape, const),
            pl.BlockSpec(params["w2"].shape, const),
            pl.BlockSpec(params["b2"].shape, const),
            pl.BlockSpec(params["w3t"].shape, const),
            pl.BlockSpec(params["b3t"].shape, const),
        ],
        out_specs=pl.BlockSpec((o_pad, TB), lambda i: (0, i)),
        compiler_params=pltpu.CompilerParams(
            dimension_semantics=("parallel",)),
        cost_estimate=cost,
    )(x, params["w1"], params["b1"], params["w2"], params["b2"],
      params["w3t"], params["b3t"])

    # Callers that can consume Q-values as (o_dim, B) should use out_t directly
    # and skip this tiny transpose; it is kept for (B, o_dim) API parity.
    return out_t[:o_dim, :B].T


def init_params(key, i_dim, h_dim, o_dim, w_dtype=jnp.bfloat16):
    """Deterministic synthetic parameters matching DQN(i_dim, h_dim, o_dim).

    Eval-mode BN fold:  BN(Wx + b) = (Wx) * s + (s*(b - mean) + beta),
    s = gamma/sqrt(var + eps).  The per-column scale s is folded into the
    weights; only fused f32 biases remain.  Hidden dims are zero-padded to
    exactly 128 (lane floor).  fc3 is stored pre-transposed (o_pad, h2_p) with
    o_pad = round_up(o_dim, 8), so the kernel can emit a narrow transposed
    output tile.
    """
    eps = 1e-5
    h2 = h_dim // 2
    h_dim_p = _round_up(h_dim, 128)
    h2_p = _round_up(h2, 128)
    o_pad = _round_up(o_dim, 8)
    ks = jax.random.split(key, 14)

    def lin(kw, kb, fan_in, fan_out):
        bound = 1.0 / jnp.sqrt(fan_in)
        w = jax.random.uniform(kw, (fan_in, fan_out), jnp.float32, -bound, bound)
        b = jax.random.uniform(kb, (fan_out,), jnp.float32, -bound, bound)
        return w, b

    def bn(kg, kb, km, kv, dim):
        gamma = 1.0 + 0.1 * jax.random.normal(kg, (dim,), jnp.float32)
        beta = 0.1 * jax.random.normal(kb, (dim,), jnp.float32)
        mean = 0.1 * jax.random.normal(km, (dim,), jnp.float32)
        var = jnp.abs(jax.random.normal(kv, (dim,), jnp.float32)) + 0.5
        return gamma, beta, mean, var

    w1, fb1 = lin(ks[0], ks[1], i_dim, h_dim)
    w2, fb2 = lin(ks[2], ks[3], h_dim, h2)
    w3, fb3 = lin(ks[4], ks[5], h2, o_dim)
    g1, be1, m1, v1 = bn(ks[6], ks[7], ks[8], ks[9], h_dim)
    g2, be2, m2, v2 = bn(ks[10], ks[11], ks[12], ks[13], h2)

    s1 = g1 / jnp.sqrt(v1 + eps)
    s2 = g2 / jnp.sqrt(v2 + eps)
    w1f, b1f = w1 * s1[None, :], s1 * (fb1 - m1) + be1   # BN1 folded into fc1
    w2f, b2f = w2 * s2[None, :], s2 * (fb2 - m2) + be2   # BN2 folded into fc2

    def pad_w(w, rows, cols):
        return jnp.pad(w, ((0, rows - w.shape[0]), (0, cols - w.shape[1])))

    def pad_row(b, cols):
        return jnp.pad(b, (0, cols - b.shape[0])).reshape(1, cols)

    return {
        "w1": pad_w(w1f, i_dim, h_dim_p).astype(w_dtype),
        "b1": pad_row(b1f, h_dim_p).astype(jnp.float32),
        "w2": pad_w(w2f, h_dim_p, h2_p).astype(w_dtype),
        "b2": pad_row(b2f, h2_p).astype(jnp.float32),
        # fc3 weight pre-transposed: (o_pad, h2_p); bias as a column (o_pad, 1).
        "w3t": pad_w(w3.T, o_pad, h2_p).astype(w_dtype),
        "b3t": jnp.pad(fb3, (0, o_pad - o_dim)).reshape(o_pad, 1).astype(jnp.float32),
    }


def dqn_ref(x, params, o_dim):
    """Same math as the kernel (bf16 weights, f32 accumulation), run by XLA."""
    def mm(a, w):
        return jnp.dot(a.astype(jnp.bfloat16), w, preferred_element_type=jnp.float32)
    h1 = jnp.maximum(mm(x, params["w1"]) + params["b1"], 0.0)
    h2 = jnp.maximum(mm(h1, params["w2"]) + params["b2"], 0.0)
    out = mm(h2, params["w3t"].T) + params["b3t"].T
    return out[:, :o_dim]


if __name__ == "__main__":
    B, i_dim, h_dim, o_dim = 8, 32, 64, 8
    key = jax.random.PRNGKey(0)
    kx, kp = jax.random.split(key)
    x = jax.random.normal(kx, (B, i_dim), jnp.float32)
    params = init_params(kp, i_dim, h_dim, o_dim)

    out = jax.block_until_ready(dqn_forward(x, params, o_dim=o_dim))
    ref = dqn_ref(x, params, o_dim)
    assert out.shape == (B, o_dim)
    assert jnp.allclose(out, ref, atol=2e-3, rtol=2e-3), \
        float(jnp.max(jnp.abs(out - ref)))
    print("KERNEL_OK")
</pallas_src>

<mosaic_0001>
module attributes {stable_mosaic.version = 11 : i64} {
  func.func @dqn_kernel(%arg0: i32, %arg1: memref<8x32xf32, #tpu.memory_space<vmem>>, %arg2: memref<32x128xbf16, #tpu.memory_space<vmem>>, %arg3: memref<1x128xf32, #tpu.memory_space<vmem>>, %arg4: memref<128x128xbf16, #tpu.memory_space<vmem>>, %arg5: memref<1x128xf32, #tpu.memory_space<vmem>>, %arg6: memref<8x128xbf16, #tpu.memory_space<vmem>>, %arg7: memref<8x1xf32, #tpu.memory_space<vmem>>, %arg8: memref<8x8xf32, #tpu.memory_space<vmem>>) attributes {dimension_semantics = [#tpu.dimension_semantics<parallel>], iteration_bounds = array<i64: 1>, scalar_prefetch = 0 : i64, scratch_operands = 0 : i64, tpu.core_type = #tpu.core_type<tc>, window_params = [{transform_indices = @transform_0, window_bounds = array<i64: 8, 32>}, {pipeline_mode = #tpu.pipeline_mode<synchronous>, transform_indices = @transform_1, window_bounds = array<i64: 32, 128>}, {pipeline_mode = #tpu.pipeline_mode<synchronous>, transform_indices = @transform_2, window_bounds = array<i64: 1, 128>}, {pipeline_mode = #tpu.pipeline_mode<synchronous>, transform_indices = @transform_3, window_bounds = array<i64: 128, 128>}, {pipeline_mode = #tpu.pipeline_mode<synchronous>, transform_indices = @transform_4, window_bounds = array<i64: 1, 128>}, {pipeline_mode = #tpu.pipeline_mode<synchronous>, transform_indices = @transform_5, window_bounds = array<i64: 8, 128>}, {pipeline_mode = #tpu.pipeline_mode<synchronous>, transform_indices = @transform_6, window_bounds = array<i64: 8, 1>}, {transform_indices = @transform_7, window_bounds = array<i64: 8, 8>}]} {
    %c0 = arith.constant 0 : index
    %c0_0 = arith.constant 0 : index
    %0 = vector.load %arg1[%c0, %c0_0] : memref<8x32xf32, #tpu.memory_space<vmem>>, vector<8x32xf32>
    %1 = arith.truncf %0 : vector<8x32xf32> to vector<8x32xbf16>
    %c0_1 = arith.constant 0 : index
    %c0_2 = arith.constant 0 : index
    %2 = vector.load %arg2[%c0_1, %c0_2] : memref<32x128xbf16, #tpu.memory_space<vmem>>, vector<32x128xbf16>
    %cst = arith.constant dense<0.000000e+00> : vector<8x128xf32>
    %3 = tpu.matmul %1, %2, %cst {dimension_numbers = #tpu.dot_dimension_numbers<[1], [0], [0], [1], [0, 0, 1, 1], [], []>} : vector<8x32xbf16>, vector<32x128xbf16>, vector<8x128xf32> -> vector<8x128xf32>
    %c0_3 = arith.constant 0 : index
    %c0_4 = arith.constant 0 : index
    %4 = vector.load %arg3[%c0_3, %c0_4] : memref<1x128xf32, #tpu.memory_space<vmem>>, vector<1x128xf32>
    %5 = vector.broadcast %4 : vector<1x128xf32> to vector<8x128xf32>
    %6 = arith.addf %3, %5 : vector<8x128xf32>
    %cst_5 = arith.constant 0.000000e+00 : f32
    %7 = vector.broadcast %cst_5 : f32 to vector<8x128xf32>
    %8 = arith.maximumf %6, %7 : vector<8x128xf32>
    %9 = arith.truncf %8 : vector<8x128xf32> to vector<8x128xbf16>
    %c0_6 = arith.constant 0 : index
    %c0_7 = arith.constant 0 : index
    %10 = vector.load %arg4[%c0_6, %c0_7] : memref<128x128xbf16, #tpu.memory_space<vmem>>, vector<128x128xbf16>
    %cst_8 = arith.constant dense<0.000000e+00> : vector<8x128xf32>
    %11 = tpu.matmul %9, %10, %cst_8 {dimension_numbers = #tpu.dot_dimension_numbers<[1], [0], [0], [1], [0, 0, 1, 1], [], []>} : vector<8x128xbf16>, vector<128x128xbf16>, vector<8x128xf32> -> vector<8x128xf32>
    %c0_9 = arith.constant 0 : index
    %c0_10 = arith.constant 0 : index
    %12 = vector.load %arg5[%c0_9, %c0_10] : memref<1x128xf32, #tpu.memory_space<vmem>>, vector<1x128xf32>
    %13 = vector.broadcast %12 : vector<1x128xf32> to vector<8x128xf32>
    %14 = arith.addf %11, %13 : vector<8x128xf32>
    %cst_11 = arith.constant 0.000000e+00 : f32
    %15 = vector.broadcast %cst_11 : f32 to vector<8x128xf32>
    %16 = arith.maximumf %14, %15 : vector<8x128xf32>
    %c0_12 = arith.constant 0 : index
    %c0_13 = arith.constant 0 : index
    %17 = vector.load %arg6[%c0_12, %c0_13] : memref<8x128xbf16, #tpu.memory_space<vmem>>, vector<8x128xbf16>
    %18 = arith.truncf %16 : vector<8x128xf32> to vector<8x128xbf16>
    %cst_14 = arith.constant dense<0.000000e+00> : vector<8x8xf32>
    %19 = tpu.matmul %17, %18, %cst_14 {dimension_numbers = #tpu.dot_dimension_numbers<[1], [1], [0], [0], [0, 0, 1, 0], [], []>} : vector<8x128xbf16>, vector<8x128xbf16>, vector<8x8xf32> -> vector<8x8xf32>
    %c0_15 = arith.constant 0 : index
    %c0_16 = arith.constant 0 : index
    %20 = vector.load %arg7[%c0_15, %c0_16] : memref<8x1xf32, #tpu.memory_space<vmem>>, vector<8x1xf32>
    %21 = vector.broadcast %20 : vector<8x1xf32> to vector<8x8xf32>
    %22 = arith.addf %19, %21 : vector<8x8xf32>
    %c0_17 = arith.constant 0 : index
    %c0_18 = arith.constant 0 : index
    %23 = vector.load %arg8[%c0_17, %c0_18] : memref<8x8xf32, #tpu.memory_space<vmem>>, vector<8x8xf32>
    tpu.vector_store %arg8[%c0_17, %c0_18], %22 {strides = array<i32>} : memref<8x8xf32, #tpu.memory_space<vmem>>, vector<8x8xf32>,
    return
  }
  func.func @transform_0(%arg0: i32) -> (i32, i32) {
    %c0_i32 = arith.constant 0 : i32
    %c0_i32_0 = arith.constant 0 : i32
    return %arg0, %c0_i32 : i32, i32
  }
  func.func @transform_1(%arg0: i32) -> (i32, i32) {
    %c0_i32 = arith.constant 0 : i32
    %c0_i32_0 = arith.constant 0 : i32
    %c0_i32_1 = arith.constant 0 : i32
    return %c0_i32, %c0_i32_0 : i32, i32
  }
  func.func @transform_2(%arg0: i32) -> (i32, i32) {
    %c0_i32 = arith.constant 0 : i32
    %c0_i32_0 = arith.constant 0 : i32
    %c0_i32_1 = arith.constant 0 : i32
    return %c0_i32, %c0_i32_0 : i32, i32
  }
  func.func @transform_3(%arg0: i32) -> (i32, i32) {
    %c0_i32 = arith.constant 0 : i32
    %c0_i32_0 = arith.constant 0 : i32
    %c0_i32_1 = arith.constant 0 : i32
    return %c0_i32, %c0_i32_0 : i32, i32
  }
  func.func @transform_4(%arg0: i32) -> (i32, i32) {
    %c0_i32 = arith.constant 0 : i32
    %c0_i32_0 = arith.constant 0 : i32
    %c0_i32_1 = arith.constant 0 : i32
    return %c0_i32, %c0_i32_0 : i32, i32
  }
  func.func @transform_5(%arg0: i32) -> (i32, i32) {
    %c0_i32 = arith.constant 0 : i32
    %c0_i32_0 = arith.constant 0 : i32
    %c0_i32_1 = arith.constant 0 : i32
    return %c0_i32, %c0_i32_0 : i32, i32
  }
  func.func @transform_6(%arg0: i32) -> (i32, i32) {
    %c0_i32 = arith.constant 0 : i32
    %c0_i32_0 = arith.constant 0 : i32
    %c0_i32_1 = arith.constant 0 : i32
    return %c0_i32, %c0_i32_0 : i32, i32
  }
  func.func @transform_7(%arg0: i32) -> (i32, i32) {
    %c0_i32 = arith.constant 0 : i32
    %c0_i32_0 = arith.constant 0 : i32
    return %c0_i32, %arg0 : i32, i32
  }
}

</mosaic_0001>

<bundles_post_ra>
// kernel: tpu_custom_call.1
= control target key start
LH: loop header
LB: loop body
LE: loop exit
PB: predicated region body
PF: predicated region fallthrough
CT: control target
= control target key end

     0   :  { %12 = vsyncpa [#allocation3], 0  ;;  %s559_s0 = inlined_call_operand.vmem [shape: f32[8,32], index: 0, kind: input, shape index: {}]   ;;  %s560_s1 = inlined_call_operand.hbm [shape: bf16[32,128], index: 1, kind: input, shape index: {}]   ;;  %s561_s2 = inlined_call_operand.vmem [shape: f32[1,128], index: 2, kind: input, shape index: {}]   ;;  %s562_s3 = inlined_call_operand.hbm [shape: bf16[128,128], index: 3, kind: input, shape index: {}]   ;;  %s563_s4 = inlined_call_operand.vmem [shape: f32[1,128], index: 4, kind: input, shape index: {}]   ;;  %s564_s5 = inlined_call_operand.vmem [shape: bf16[8,128], index: 5, kind: input, shape index: {}]   ;;  %s565_s6 = inlined_call_operand.vmem [shape: f32[8,1], index: 6, kind: input, shape index: {}]   ;;  %s566_s7 = inlined_call_operand.hbm [shape: f32[8,8], index: 7, kind: output, shape index: {}]  }
   0x1   :  { %13 = vsyncpa [#allocation6], 0 }
   0x2   :  { %14 = vsyncpa [#allocation4], 0  ;;  %s457_s24 = smov [#allocation2]   ;;  %s385_s28 = scalar_lea.hbm %s560_s1, 256 }
   0x3   :  { %s22_s25 = sshll.u32 %s457_s24, 4  ;;  %p386_p0 = scmp.ne.s32.totalorder %s560_s1, %s385_s28  ;;  %s23_s25 = int_to_ptr.vmem [resolvable:$true] %s22_s25 }
   0x4   :  { %p389_p1 = scmp.lt.u32.totalorder %s385_s28, %s560_s1 }
   0x6   :  { %p391_p2 = pnand %p389_p1, %p386_p0 }
   0x8   :  { %394 = shalt.err (!%p391_p2)
}
   0x9   :  { %s395_s10 = scalar_lea.vmem %s23_s25, 256  ;;  %p400_p4 = scmp.lt.s32.totalorder %s23_s25, %s23_s25 }
   0xa   :  { %p396_p3 = scmp.ne.s32.totalorder %s23_s25, %s395_s10  ;;  %p401_p5 = scmp.lt.s32.totalorder %s395_s10, %s395_s10 }
   0xc   :  { %p402_p6 = por %p401_p5, %p400_p4 }
   0xe   :  { %p403_p7 = pnand %p402_p6, %p396_p3 }
  0x10   :  { %406 = shalt.err (!%p403_p7)
}
  0x11   :  { %s458_s11 = smov 64   ;;  %s459_s12 = smov 4  }
  0x12   :  { %28 = dma.hbm_to_vmem [thread:$0]  %s560_s1, 256, %s23_s25, [#allocation3], %s458_s11, %s458_s11, %s459_s12  }
  0x13   :  { %s460_s15 = smov [#allocation5]   ;;  %s407_s19 = scalar_lea.hbm %s562_s3, 1024 }
  0x14   :  { %s36_s16 = sshll.u32 %s460_s15, 4  ;;  %p408_p8 = scmp.ne.s32.totalorder %s562_s3, %s407_s19  ;;  %s37_s16 = int_to_ptr.vmem [resolvable:$true] %s36_s16 }
  0x15   :  { %p411_p9 = scmp.lt.u32.totalorder %s407_s19, %s562_s3 }
  0x17   :  { %p413_p10 = pnand %p411_p9, %p408_p8 }
  0x19   :  { %416 = shalt.err (!%p413_p10)
}
  0x1a   :  { %s417_s24 = scalar_lea.vmem %s37_s16, 1024  ;;  %p422_p12 = scmp.lt.s32.totalorder %s37_s16, %s37_s16 }
  0x1b   :  { %p418_p11 = scmp.ne.s32.totalorder %s37_s16, %s417_s24  ;;  %p423_p13 = scmp.lt.s32.totalorder %s417_s24, %s417_s24 }
  0x1d   :  { %p424_p0 = por %p423_p13, %p422_p12 }
  0x1f   :  { %p425_p1 = pnand %p424_p0, %p418_p11 }
  0x21   :  { %428 = shalt.err (!%p425_p1)
}
  0x22   :  { %42 = dma.hbm_to_vmem [thread:$0]  %s562_s3, 1024, %s37_s16, [#allocation6], %s458_s11, %s458_s11, %s459_s12  }
  0x23   :  { %451 = dma.done.wait [#allocation3], 256  }
  0x24   :  { %452 = vsyncadd [#allocation3], 4294967040 }
  0x25   :  { %453 = dma.done.wait [#allocation6], 1024  }
  0x26   :  { %454 = vsyncadd [#allocation6], 4294966272  ;;  %v461_v0 = vmov 0.0   ;;  %vm462_vm0 = vmmov 0   ;;  %v375_v1 = vld [vmem:[#allocation2] sm:$0xff]   ;;  %v376_v2 = vld [vmem:[#allocation2 + $0x8] sm:$0xff]  }
  0x27   :  { %332 = vmatprep.subr.bf16.mxu0 %v461_v0  ;;  %336 = vmatprep.mubr.msk.bf16.mxu0 %vm462_vm0, %v461_v0  ;;  %v56_v3 = vld [vmem:[%s559_s0] sm:$0xff]  ;;  %v377_v4 = vld [vmem:[#allocation5] sm:$0xff]   ;;  %v378_v6 = vld [vmem:[#allocation5 + $0x8] sm:$0xff]   ;;  %vm81_vm1 = vcmask 261120   ;;  %v463_v22 = vmov 0   ;;  %vm287_vm2 = vcmask 64512  }
  0x28   :  { %340 = vmatprep.subr.bf16.mxu1 %v461_v0  ;;  %356 = vmatprep.mubr.msk.bf16.mxu1 %vm462_vm0, %v461_v0  ;;  %v57_v5 = vpack.c.bf16 %v56_v3, %v56_v3  ;;  %v379_v7 = vld [vmem:[#allocation5 + $0x10] sm:$0xff]   ;;  %v380_v8 = vld [vmem:[#allocation5 + $0x18] sm:$0xff]   ;;  %v381_v9 = vld [vmem:[#allocation5 + $0x20] sm:$0xff]  }
  0x29   :  { %333 = vmatpush3.bf16.msra.mxu0 %v375_v1  ;;  %341 = vmatpush3.bf16.msra.mxu1 %v377_v4  ;;  %v382_v10 = vld [vmem:[#allocation5 + $0x28] sm:$0xff]   ;;  %v383_v11 = vld [vmem:[#allocation5 + $0x30] sm:$0xff]   ;;  %v384_v12 = vld [vmem:[#allocation5 + $0x38] sm:$0xff]  }
  0x2a   :  { %334 = vmatprep.subr.bf16.mxu0 %v461_v0  ;;  %342 = vmatprep.subr.bf16.mxu1 %v461_v0  ;;  %v305_v13 = vld [vmem:[%s561_s2] ss:$0 sm:$0xff] }
  0x2b   :  { %v241_v21 = vld [vmem:[%s565_s6] sm:$0xff]  ;;  %374 = vset.pattern.permute.xlu0 %v463_v22  ;;  %s464_s6 = smov [#allocation7]  }
  0x2c   :  { %244 = vperm.xlu0 %374, %v241_v21   ;;  %v309_v23 = vld [vmem:[%s563_s4] ss:$0 sm:$0xff]  ;;  %s295_s10 = sshll.u32 %s464_s6, 4  ;;  %s296_s10 = int_to_ptr.vmem [resolvable:$true] %s295_s10 }
  0x2d   :  { %335 = vmatpush3.bf16.msra.mxu0 %v376_v2  ;;  %343 = vmatpush3.bf16.msra.mxu1 %v378_v6  ;;  %v239_v31 = vld [vmem:[%s564_s5] sm:$0xf]  ;;  %s429_s4 = scalar_lea.vmem %s296_s10, 128  ;;  %p434_p3 = scmp.lt.s32.totalorder %s296_s10, %s296_s10 }
  0x2e   :  { %360 = vmatprep.subr.bf16.mxu0 %v461_v0  ;;  %344 = vmatprep.subr.bf16.mxu1 %v461_v0  ;;  %p430_p2 = scmp.ne.s32.totalorder %s296_s10, %s429_s4  ;;  %p435_p4 = scmp.lt.s32.totalorder %s429_s4, %s429_s4 }
  0x30   :  { %337 = vmatmul.mubr.msk.bf16.vlgmr.msra.gmra.mrb[0].mxu0 %vm81_vm1, %v57_v5  ;;  %p436_p5 = por %p435_p4, %p434_p3 }
  0x31   :  { %362 = vmatprep.mubr.msk.bf16.mxu0 %vm462_vm0, %v461_v0  ;;  %345 = vmatpush3.bf16.msra.mxu1 %v379_v7 }
  0x32   :  { %346 = vmatprep.subr.bf16.mxu1 %v461_v0  ;;  %p437_p6 = pnand %p436_p5, %p430_p2 }
  0x35   :  { %347 = vmatpush3.bf16.msra.mxu1 %v380_v8 }
  0x36   :  { %348 = vmatprep.subr.bf16.mxu1 %v461_v0 }
  0x39   :  { %349 = vmatpush3.bf16.msra.mxu1 %v381_v9 }
  0x3a   :  { %350 = vmatprep.subr.bf16.mxu1 %v461_v0 }
  0x3d   :  { %351 = vmatpush3.bf16.msra.mxu1 %v382_v10 }
  0x3e   :  { %352 = vmatprep.subr.bf16.mxu1 %v461_v0 }
  0x41   :  { %353 = vmatpush3.bf16.msra.mxu1 %v383_v11 }
  0x42   :  { %354 = vmatprep.subr.bf16.mxu1 %v461_v0 }
  0x45   :  { %355 = vmatpush3.bf16.msra.mxu1 %v384_v12 }
  0xab   :  { %v245_v32 = vpop.permute.xlu0 %244 }
 0x103   :  { %v119_v14 = vpop.f32.mrb[0].mxu0 }
 0x104   :  { %v120_v15 = vadd.f32 %v305_v13, %v119_v14  ;;  %v338_v16 = vpop.f32.mrb[1].mxu0 }
 0x105   :  { %v122_v17 = vpop.f32.mrb[2].mxu0 }
 0x106   :  { %v125_v18 = vmax.f32 %v120_v15, 0.0  ;;  %v339_v19 = vpop.f32.mrb[3].mxu0 }
 0x108   :  { %v126_v20 = vpack.c.bf16 %v125_v18, %v125_v18 }
 0x10a   :  { %357 = vmatmul.mubr.bf16.vlgmr.msra.gmra.mrb[0].mxu1 %v126_v20 }
 0x1dd   :  { %v232_v24 = vpop.f32.mrb[0].mxu1 }
 0x1de   :  { %v233_v25 = vadd.f32 %v309_v23, %v232_v24  ;;  %v358_v26 = vpop.f32.mrb[1].mxu1 }
 0x1df   :  { %v235_v27 = vpop.f32.mrb[2].mxu1 }
 0x1e0   :  { %v238_v28 = vmax.f32 %v233_v25, 0.0  ;;  %v359_v29 = vpop.f32.mrb[3].mxu1 }
 0x1e2   :  { %v240_v30 = vpack.c.bf16 %v238_v28, %v238_v28 }
 0x1e4   :  { %361 = vmatpush3.bf16.xpose.msra.mxu0 %v240_v30 }
 0x1eb   :  { %363 = vmatmul.mubr.bf16.vlgmr.msra.gmra.mrb[4].mxu0 %v239_v31 }
 0x2be   :  { %v281_v33 = vpop.f32.mrb[4].mxu0 }
 0x2bf   :  { %v282_v34 = vadd.f32 %v281_v33, %v245_v32  ;;  %v364_v35 = vpop.f32.mrb[5].mxu0 }
 0x2c0   :  { %v284_v36 = vpop.f32.mrb[6].mxu0 }
 0x2c1   :  { %v365_v37 = vpop.f32.mrb[7].mxu0  ;;  %288 = vst.msk [vmem:[#allocation7] sm:$0xff] %vm287_vm2, %v282_v34 }
 0x2c2   :  { %440 = shalt.err (!%p437_p6)
}
 0x2c3   :  { %s441_s12 = scalar_lea.hbm %s566_s7, 128 }
 0x2c4   :  { %p442_p7 = scmp.ne.s32.totalorder %s566_s7, %s441_s12  ;;  %p445_p8 = scmp.lt.u32.totalorder %s441_s12, %s566_s7 }
 0x2c6   :  { %p447_p9 = pnand %p445_p8, %p442_p7 }
 0x2c8   :  { %450 = shalt.err (!%p447_p9)
}
 0x2c9   :  { %298 = dma.vmem_to_hbm [thread:$0]  %s296_s10, 128, %s566_s7, [#allocation4]  }
 0x2ca   :  { %455 = dma.done.wait [#allocation4], 128  }
 0x2cb   :  { %456 = vsyncadd [#allocation4], 4294967168 }
 0x2cc   :  { %302 = vsyncpa [#allocation3], 1 }
 0x2cd   :  { %303 = vsyncpa [#allocation6], 1 }
 0x2ce   :  { %304 = vsyncpa [#allocation4], 1 }

</bundles_post_ra>
